<compile_context>
chip_gen: v6e
topology: v6e:2x2x1
jax: 0.10.0
libtpu: 0.0.40
codegen_flags: <defaults>
</compile_context>

<pallas_src>
import jax
import jax.numpy as jnp
from jax.experimental import pallas as pl
from jax.experimental.pallas import tpu as pltpu

LEAKY_SLOPE = 0.01
BN_EPS = 1e-5

# Packed-parameter layout (one [_PROWS, _PCOLS] f32 slab):
#   weights of layer L occupy cols [woff, woff + n_in), rows [0, n_out)
#   bias    of layer L occupies col _WCOLS + L,          rows [0, n_out)
# Layer order (BN1/BN2 are folded into layer 1 by the wrapper; z_mean and
# z_log_var are merged into one n_out=8 layer):
_LAYERS = (  # (woff, n_out, n_in)
    (0, 5, 6),    # 0: enc Linear(6,5)
    (6, 5, 5),    # 1: enc Linear(5,5) + BN1 + BN2 folded
    (11, 8, 5),   # 2: [z_mean; z_log_var] Linear(5,8)
    (16, 5, 4),   # 3: dec Linear(4,5)
    (20, 5, 5),   # 4: dec Linear(5,5)
    (25, 6, 5),   # 5: dec Linear(5,6)
)
_WCOLS = 30
_PCOLS = _WCOLS + len(_LAYERS)   # 36
_PROWS = 8
_MIN_TILES = 4                   # >= 2 tiles per TensorCore on v7x when B allows


def _round_up(a, m):
    return -(-a // m) * m


def _lin(p_ref, h, layer):
    """Feature-major linear as unrolled VPU broadcast-FMAs.

    h: [n_in, TB]; returns [n_out, TB] = W @ h + b with
    W = p_ref[0:n_out, woff:woff+n_in], b = p_ref[0:n_out, _WCOLS+layer].
    """
    woff, n_out, n_in = _LAYERS[layer]
    acc = p_ref[0:n_out, _WCOLS + layer:_WCOLS + layer + 1]          # bias [n_out, 1]
    for k in range(n_in):
        acc = acc + p_ref[0:n_out, woff + k:woff + k + 1] * h[k:k + 1, :]
    return acc


def _lrelu(h):
    # valid for 0 < slope < 1: max(h, slope*h) == LeakyReLU(h); 2 VPU ops.
    return jnp.maximum(h, LEAKY_SLOPE * h)


# ----------------------------------------------------------------------------
# Pass 1: per-tile partial BatchNorm moments of h1 = LeakyReLU(W1 x + b1).
# Each tile writes its own [5, 6] partial ( [:, 0:5] = sum h1 h1^T, [:, 5] =
# sum h1 ), so the grid axis is fully parallel; the wrapper sums the partials
# and removes the zero-padded columns' exact contribution analytically.
# ----------------------------------------------------------------------------
def _bn_stats_kernel(in_ref, p1_ref, ms_ref):
    x = in_ref[0:6, :]                                   # [6, TB]
    acc = p1_ref[0:5, 6:7]                               # b1 [5, 1]
    for k in range(6):
        acc = acc + p1_ref[0:5, k:k + 1] * x[k:k + 1, :]
    h1 = _lrelu(acc)                                     # [5, TB]
    m = jnp.einsum("it,jt->ij", h1, h1, preferred_element_type=jnp.float32)  # [5, 5]
    s = jnp.sum(h1, axis=1, keepdims=True)               # [5, 1]
    ms_ref[0, :, :] = jnp.concatenate([m, s], axis=1)    # [5, 6]


# ----------------------------------------------------------------------------
# Pass 2: full forward, BatchNorms pre-folded into layer 1, mu/lv merged.
# Packed [18, TB] output per tile: rows 0:4 encoded (z), 4:8 z_mean,
# 8:12 z_log_var, 12:18 decoded.
# ----------------------------------------------------------------------------
def _vae_fwd_kernel(in_ref, p_ref, out_ref):
    x = in_ref[0:6, :]                                   # [6, TB]
    e = in_ref[6:10, :]                                  # [4, TB]

    h = _lrelu(_lin(p_ref, x, 0))                        # Linear(6,5) + LeakyReLU
    h = _lrelu(_lin(p_ref, h, 1))                        # Linear(5,5)+BN1+BN2 folded + LeakyReLU
    mulv = _lin(p_ref, h, 2)                             # [8, TB]: rows 0:4 mu, 4:8 lv
    z = mulv[0:4, :] + e * jnp.exp(mulv[4:8, :] * 0.5)   # reparameterize
    d = jnp.maximum(_lin(p_ref, z, 3), 0.0)              # Linear(4,5) + ReLU
    d = jnp.maximum(_lin(p_ref, d, 4), 0.0)              # Linear(5,5) + ReLU
    dec = _lin(p_ref, d, 5)                              # Linear(5,6)

    out_ref[0:4, :] = z
    out_ref[4:12, :] = mulv
    out_ref[12:18, :] = dec


def vae_linear_1003_forward(x, eps, params, *, tile_b=4096):
    """x: [B, 6] f32, eps: [B, 4] f32, params: PyTorch-layout weights ([out, in])."""
    B = x.shape[0]
    assert tile_b % 128 == 0, "batch tile must be a multiple of 128 lanes"

    # Padding decoupled from tile size: pad batch only to a multiple of 128,
    # then split into roughly-equal 128-aligned tiles (<= tile_b each).
    Bp128 = _round_up(B, 128)
    n_tiles = max(-(-Bp128 // tile_b), min(_MIN_TILES, Bp128 // 128))
    TB = _round_up(-(-Bp128 // n_tiles), 128)
    Bp = n_tiles * TB

    # Single fused feature-major input slab: rows 0:6 = x^T, rows 6:10 = eps^T.
    slab = jnp.concatenate([jnp.asarray(x, jnp.float32),
                            jnp.asarray(eps, jnp.float32)], axis=1)   # [B, 10]
    slab = jnp.pad(slab, ((0, Bp - B), (0, 0))).T                     # [10, Bp]

    w1, b1 = params["w1"], params["b1"]
    w2, b2 = params["w2"], params["b2"]

    # ---- pass 1: per-tile partial moments of h1 (parallel over tiles) -------
    p1 = jnp.concatenate([w1, b1[:, None]], axis=1)                   # [5, 7]
    partial = pl.pallas_call(
        _bn_stats_kernel,
        out_shape=jax.ShapeDtypeStruct((n_tiles, 5, 6), jnp.float32),
        grid_spec=pltpu.PrefetchScalarGridSpec(
            num_scalar_prefetch=0,
            grid=(n_tiles,),
            in_specs=[pl.BlockSpec((10, TB), lambda i: (0, i)),
                      pl.BlockSpec((5, 7), lambda i: (0, 0))],
            out_specs=pl.BlockSpec((1, 5, 6), lambda i: (i, 0, 0)),
        ),
        compiler_params=pltpu.CompilerParams(dimension_semantics=("parallel",)),
    )(slab, p1)

    ms = jnp.sum(partial, axis=0)                                     # [5, 6]
    # Remove the zero-padded columns' exact contribution: h1_pad = lrelu(b1).
    h1_pad = jnp.maximum(b1, LEAKY_SLOPE * b1)
    npad = jnp.float32(Bp - B)
    M = ms[:, 0:5] - npad * jnp.outer(h1_pad, h1_pad)
    S = ms[:, 5] - npad * h1_pad

    # ---- exact BN1 / BN2 batch statistics, folded into layer 1 --------------
    Bf = jnp.float32(B)
    mean1 = S / Bf
    cov1 = M / Bf - jnp.outer(mean1, mean1)               # biased covariance of h1
    var1 = jnp.maximum(jnp.diagonal(cov1), 0.0)
    scale1 = params["g1"] / jnp.sqrt(var1 + BN_EPS)
    shift1 = params["be1"] - mean1 * scale1
    # h2 = W2 @ bn1(h1) + b2 = A @ h1 + c  (affine in h1) -> exact BN2 stats
    A = w2 * scale1[None, :]                              # [5, 5]
    c = w2 @ shift1 + b2                                  # [5]
    mean2 = A @ mean1 + c
    var2 = jnp.maximum(jnp.sum((A @ cov1) * A, axis=1), 0.0)
    scale2 = params["g2"] / jnp.sqrt(var2 + BN_EPS)
    shift2 = params["be2"] - mean2 * scale2
    w2f = scale2[:, None] * A                             # BN2(BN1-folded Linear2)
    b2f = scale2 * c + shift2

    # ---- pack all parameters into one [8, 36] slab ---------------------------
    wmv = jnp.concatenate([params["wm"], params["wv"]], axis=0)       # [8, 5]
    bmv = jnp.concatenate([params["bm"], params["bv"]], axis=0)       # [8]
    packed = [(w1, b1), (w2f, b2f), (wmv, bmv),
              (params["wd1"], params["bd1"]),
              (params["wd2"], params["bd2"]),
              (params["wd3"], params["bd3"])]
    P = jnp.zeros((_PROWS, _PCOLS), jnp.float32)
    for layer, (w, b) in enumerate(packed):
        woff, n_out, n_in = _LAYERS[layer]
        P = P.at[:n_out, woff:woff + n_in].set(w)
        P = P.at[:n_out, _WCOLS + layer].set(b)

    # ---- pass 2: the forward itself (parallel over batch tiles) -------------
    out_slab = pl.pallas_call(
        _vae_fwd_kernel,
        out_shape=jax.ShapeDtypeStruct((18, Bp), jnp.float32),
        grid_spec=pltpu.PrefetchScalarGridSpec(
            num_scalar_prefetch=0,
            grid=(n_tiles,),
            in_specs=[pl.BlockSpec((10, TB), lambda i: (0, i)),
                      pl.BlockSpec((_PROWS, _PCOLS), lambda i: (0, 0))],
            out_specs=pl.BlockSpec((18, TB), lambda i: (0, i)),
        ),
        compiler_params=pltpu.CompilerParams(dimension_semantics=("parallel",)),
    )(slab, P)

    out = out_slab[:, :B].T                               # single transpose -> [B, 18]
    encoded = out[:, 0:4]
    z_mean = out[:, 4:8]
    z_log_var = out[:, 8:12]
    decoded = out[:, 12:18]
    return encoded, z_mean, z_log_var, decoded


# ----------------------------------------------------------------------------
# Parameter init (PyTorch nn.Linear layout: W [out, in], b [out]) and reference.
# ----------------------------------------------------------------------------
def init_params(key):
    def linear(k, fan_in, fan_out):
        kw, kb = jax.random.split(k)
        bound = 1.0 / jnp.sqrt(float(fan_in))
        w = jax.random.uniform(kw, (fan_out, fan_in), jnp.float32, -bound, bound)
        b = jax.random.uniform(kb, (fan_out,), jnp.float32, -bound, bound)
        return w, b

    keys = jax.random.split(key, 7)
    p = {}
    p["w1"], p["b1"] = linear(keys[0], 6, 5)
    p["g1"], p["be1"] = jnp.ones((5,), jnp.float32), jnp.zeros((5,), jnp.float32)
    p["w2"], p["b2"] = linear(keys[1], 5, 5)
    p["g2"], p["be2"] = jnp.ones((5,), jnp.float32), jnp.zeros((5,), jnp.float32)
    p["wm"], p["bm"] = linear(keys[2], 5, 4)
    p["wv"], p["bv"] = linear(keys[3], 5, 4)
    p["wd1"], p["bd1"] = linear(keys[4], 4, 5)
    p["wd2"], p["bd2"] = linear(keys[5], 5, 5)
    p["wd3"], p["bd3"] = linear(keys[6], 5, 6)
    return p


def _reference_forward(x, eps, p):
    """Pure-JAX reference (BatchNorm1d in training mode, biased batch variance)."""
    def lin(h, w, b):
        return h @ w.T + b

    def bn(h, g, be):
        m = jnp.mean(h, axis=0)
        v = jnp.mean((h - m) ** 2, axis=0)
        return (h - m) / jnp.sqrt(v + BN_EPS) * g + be

    def lrelu(h):
        return jnp.where(h >= 0, h, LEAKY_SLOPE * h)

    h = lrelu(lin(x, p["w1"], p["b1"]))
    h = bn(h, p["g1"], p["be1"])
    h = bn(lin(h, p["w2"], p["b2"]), p["g2"], p["be2"])
    h = lrelu(h)
    mu = lin(h, p["wm"], p["bm"])
    lv = lin(h, p["wv"], p["bv"])
    enc = mu + eps * jnp.exp(lv * 0.5)
    d = jnp.maximum(lin(enc, p["wd1"], p["bd1"]), 0.0)
    d = jnp.maximum(lin(d, p["wd2"], p["bd2"]), 0.0)
    dec = lin(d, p["wd3"], p["bd3"])
    return enc, mu, lv, dec


if __name__ == "__main__":
    key = jax.random.PRNGKey(0)
    k_x, k_eps, k_p = jax.random.split(key, 3)

    B = 300  # non-multiple of 128 -> exercises padding; splits into 3 batch tiles
    x = jax.random.normal(k_x, (B, 6), jnp.float32)
    eps = jax.random.normal(k_eps, (B, 4), jnp.float32)
    params = init_params(k_p)

    fwd = jax.jit(vae_linear_1003_forward, static_argnames=("tile_b",))
    outs = fwd(x, eps, params)
    outs = jax.block_until_ready(outs)

    refs = _reference_forward(x, eps, params)
    for o, r in zip(outs, refs):
        assert o.shape == r.shape, (o.shape, r.shape)
        assert jnp.allclose(o, r, atol=3e-3, rtol=3e-3), \
            float(jnp.max(jnp.abs(o - r)))

    print("KERNEL_OK")
</pallas_src>

<mosaic_0001>
module attributes {stable_mosaic.version = 11 : i64} {
  func.func @_bn_stats_kernel(%arg0: i32, %arg1: memref<10x128xf32, #tpu.memory_space<vmem>>, %arg2: memref<5x7xf32, #tpu.memory_space<vmem>>, %arg3: memref<1x5x6xf32, #tpu.memory_space<vmem>>) attributes {dimension_semantics = [#tpu.dimension_semantics<parallel>], iteration_bounds = array<i64: 3>, scalar_prefetch = 0 : i64, scratch_operands = 0 : i64, tpu.core_type = #tpu.core_type<tc>, window_params = [{transform_indices = @transform_0, window_bounds = array<i64: 10, 128>}, {pipeline_mode = #tpu.pipeline_mode<synchronous>, transform_indices = @transform_1, window_bounds = array<i64: 5, 7>}, {transform_indices = @transform_2, window_bounds = array<i64: 1, 5, 6>}]} {
    %c0 = arith.constant 0 : index
    %c0_0 = arith.constant 0 : index
    %0 = vector.load %arg1[%c0, %c0_0] : memref<10x128xf32, #tpu.memory_space<vmem>>, vector<6x128xf32>
    %c0_1 = arith.constant 0 : index
    %c6 = arith.constant 6 : index
    %1 = vector.load %arg2[%c0_1, %c6] : memref<5x7xf32, #tpu.memory_space<vmem>>, vector<5x1xf32>
    %c0_2 = arith.constant 0 : index
    %c0_3 = arith.constant 0 : index
    %2 = vector.load %arg2[%c0_2, %c0_3] : memref<5x7xf32, #tpu.memory_space<vmem>>, vector<5x1xf32>
    %3 = vector.extract_strided_slice %0 {offsets = [0, 0], sizes = [1, 128], strides = [1, 1]} : vector<6x128xf32> to vector<1x128xf32>
    %4 = vector.broadcast %2 : vector<5x1xf32> to vector<5x128xf32>
    %5 = vector.broadcast %3 : vector<1x128xf32> to vector<5x128xf32>
    %6 = arith.mulf %4, %5 : vector<5x128xf32>
    %7 = vector.broadcast %1 : vector<5x1xf32> to vector<5x128xf32>
    %8 = arith.addf %7, %6 : vector<5x128xf32>
    %c0_4 = arith.constant 0 : index
    %c1 = arith.constant 1 : index
    %9 = vector.load %arg2[%c0_4, %c1] : memref<5x7xf32, #tpu.memory_space<vmem>>, vector<5x1xf32>
    %10 = vector.extract_strided_slice %0 {offsets = [1, 0], sizes = [1, 128], strides = [1, 1]} : vector<6x128xf32> to vector<1x128xf32>
    %11 = vector.broadcast %9 : vector<5x1xf32> to vector<5x128xf32>
    %12 = vector.broadcast %10 : vector<1x128xf32> to vector<5x128xf32>
    %13 = arith.mulf %11, %12 : vector<5x128xf32>
    %14 = arith.addf %8, %13 : vector<5x128xf32>
    %c0_5 = arith.constant 0 : index
    %c2 = arith.constant 2 : index
    %15 = vector.load %arg2[%c0_5, %c2] : memref<5x7xf32, #tpu.memory_space<vmem>>, vector<5x1xf32>
    %16 = vector.extract_strided_slice %0 {offsets = [2, 0], sizes = [1, 128], strides = [1, 1]} : vector<6x128xf32> to vector<1x128xf32>
    %17 = vector.broadcast %15 : vector<5x1xf32> to vector<5x128xf32>
    %18 = vector.broadcast %16 : vector<1x128xf32> to vector<5x128xf32>
    %19 = arith.mulf %17, %18 : vector<5x128xf32>
    %20 = arith.addf %14, %19 : vector<5x128xf32>
    %c0_6 = arith.constant 0 : index
    %c3 = arith.constant 3 : index
    %21 = vector.load %arg2[%c0_6, %c3] : memref<5x7xf32, #tpu.memory_space<vmem>>, vector<5x1xf32>
    %22 = vector.extract_strided_slice %0 {offsets = [3, 0], sizes = [1, 128], strides = [1, 1]} : vector<6x128xf32> to vector<1x128xf32>
    %23 = vector.broadcast %21 : vector<5x1xf32> to vector<5x128xf32>
    %24 = vector.broadcast %22 : vector<1x128xf32> to vector<5x128xf32>
    %25 = arith.mulf %23, %24 : vector<5x128xf32>
    %26 = arith.addf %20, %25 : vector<5x128xf32>
    %c0_7 = arith.constant 0 : index
    %c4 = arith.constant 4 : index
    %27 = vector.load %arg2[%c0_7, %c4] : memref<5x7xf32, #tpu.memory_space<vmem>>, vector<5x1xf32>
    %28 = vector.extract_strided_slice %0 {offsets = [4, 0], sizes = [1, 128], strides = [1, 1]} : vector<6x128xf32> to vector<1x128xf32>
    %29 = vector.broadcast %27 : vector<5x1xf32> to vector<5x128xf32>
    %30 = vector.broadcast %28 : vector<1x128xf32> to vector<5x128xf32>
    %31 = arith.mulf %29, %30 : vector<5x128xf32>
    %32 = arith.addf %26, %31 : vector<5x128xf32>
    %c0_8 = arith.constant 0 : index
    %c5 = arith.constant 5 : index
    %33 = vector.load %arg2[%c0_8, %c5] : memref<5x7xf32, #tpu.memory_space<vmem>>, vector<5x1xf32>
    %34 = vector.extract_strided_slice %0 {offsets = [5, 0], sizes = [1, 128], strides = [1, 1]} : vector<6x128xf32> to vector<1x128xf32>
    %35 = vector.broadcast %33 : vector<5x1xf32> to vector<5x128xf32>
    %36 = vector.broadcast %34 : vector<1x128xf32> to vector<5x128xf32>
    %37 = arith.mulf %35, %36 : vector<5x128xf32>
    %38 = arith.addf %32, %37 : vector<5x128xf32>
    %cst = arith.constant 0.00999999977 : f32
    %39 = vector.broadcast %cst : f32 to vector<5x128xf32>
    %40 = arith.mulf %39, %38 : vector<5x128xf32>
    %41 = arith.maximumf %38, %40 : vector<5x128xf32>
    "tpu.trace_start"() <{level = 10 : i32, message = "it,jt->ij"}> : () -> ()
    %cst_9 = arith.constant dense<0.000000e+00> : vector<5x5xf32>
    %42 = tpu.matmul %41, %41, %cst_9 {dimension_numbers = #tpu.dot_dimension_numbers<[1], [1], [0], [0], [0, 0, 1, 0], [], []>} : vector<5x128xf32>, vector<5x128xf32>, vector<5x5xf32> -> vector<5x5xf32>
    "tpu.trace_stop"() : () -> ()
    %cst_10 = arith.constant dense<0.000000e+00> : vector<5xf32>
    %43 = vector.multi_reduction <add>, %41, %cst_10 [1] : vector<5x128xf32> to vector<5xf32>
    %44 = vector.shape_cast %43 : vector<5xf32> to vector<5x1xf32>
    %45 = tpu.concatenate %42, %44 in 1 : vector<5x5xf32>, vector<5x1xf32> -> vector<5x6xf32>
    %c0_11 = arith.constant 0 : index
    %c0_12 = arith.constant 0 : index
    %c0_13 = arith.constant 0 : index
    %46 = vector.load %arg3[%c0_11, %c0_12, %c0_13] : memref<1x5x6xf32, #tpu.memory_space<vmem>>, vector<1x5x6xf32>
    %47 = vector.shape_cast %46 : vector<1x5x6xf32> to vector<5x6xf32>
    %48 = vector.shape_cast %45 : vector<5x6xf32> to vector<1x5x6xf32>
    tpu.vector_store %arg3[%c0_11, %c0_12, %c0_13], %48 {strides = array<i32>} : memref<1x5x6xf32, #tpu.memory_space<vmem>>, vector<1x5x6xf32>,
    return
  }
  func.func @transform_0(%arg0: i32) -> (i32, i32) {
    %c0_i32 = arith.constant 0 : i32
    %c0_i32_0 = arith.constant 0 : i32
    return %c0_i32, %arg0 : i32, i32
  }
  func.func @transform_1(%arg0: i32) -> (i32, i32) {
    %c0_i32 = arith.constant 0 : i32
    %c0_i32_0 = arith.constant 0 : i32
    %c0_i32_1 = arith.constant 0 : i32
    return %c0_i32, %c0_i32_0 : i32, i32
  }
  func.func @transform_2(%arg0: i32) -> (i32, i32, i32) {
    %c0_i32 = arith.constant 0 : i32
    %c0_i32_0 = arith.constant 0 : i32
    %c0_i32_1 = arith.constant 0 : i32
    return %arg0, %c0_i32, %c0_i32_0 : i32, i32, i32
  }
}

module attributes {stable_mosaic.version = 11 : i64} {
  func.func @_vae_fwd_kernel(%arg0: i32, %arg1: memref<10x128xf32, #tpu.memory_space<vmem>>, %arg2: memref<8x36xf32, #tpu.memory_space<vmem>>, %arg3: memref<18x128xf32, #tpu.memory_space<vmem>>) attributes {dimension_semantics = [#tpu.dimension_semantics<parallel>], iteration_bounds = array<i64: 3>, scalar_prefetch = 0 : i64, scratch_operands = 0 : i64, tpu.core_type = #tpu.core_type<tc>, window_params = [{transform_indices = @transform_0, window_bounds = array<i64: 10, 128>}, {pipeline_mode = #tpu.pipeline_mode<synchronous>, transform_indices = @transform_1, window_bounds = array<i64: 8, 36>}, {transform_indices = @transform_2, window_bounds = array<i64: 18, 128>}]} {
    %c0 = arith.constant 0 : index
    %c0_0 = arith.constant 0 : index
    %0 = vector.load %arg1[%c0, %c0_0] : memref<10x128xf32, #tpu.memory_space<vmem>>, vector<6x128xf32>
    %c6 = arith.constant 6 : index
    %c0_1 = arith.constant 0 : index
    %1 = vector.load %arg1[%c6, %c0_1] : memref<10x128xf32, #tpu.memory_space<vmem>>, vector<4x128xf32>
    %c0_2 = arith.constant 0 : index
    %c30 = arith.constant 30 : index
    %2 = vector.load %arg2[%c0_2, %c30] : memref<8x36xf32, #tpu.memory_space<vmem>>, vector<5x1xf32>
    %c0_3 = arith.constant 0 : index
    %c0_4 = arith.constant 0 : index
    %3 = vector.load %arg2[%c0_3, %c0_4] : memref<8x36xf32, #tpu.memory_space<vmem>>, vector<5x1xf32>
    %4 = vector.extract_strided_slice %0 {offsets = [0, 0], sizes = [1, 128], strides = [1, 1]} : vector<6x128xf32> to vector<1x128xf32>
    %5 = vector.broadcast %3 : vector<5x1xf32> to vector<5x128xf32>
    %6 = vector.broadcast %4 : vector<1x128xf32> to vector<5x128xf32>
    %7 = arith.mulf %5, %6 : vector<5x128xf32>
    %8 = vector.broadcast %2 : vector<5x1xf32> to vector<5x128xf32>
    %9 = arith.addf %8, %7 : vector<5x128xf32>
    %c0_5 = arith.constant 0 : index
    %c1 = arith.constant 1 : index
    %10 = vector.load %arg2[%c0_5, %c1] : memref<8x36xf32, #tpu.memory_space<vmem>>, vector<5x1xf32>
    %11 = vector.extract_strided_slice %0 {offsets = [1, 0], sizes = [1, 128], strides = [1, 1]} : vector<6x128xf32> to vector<1x128xf32>
    %12 = vector.broadcast %10 : vector<5x1xf32> to vector<5x128xf32>
    %13 = vector.broadcast %11 : vector<1x128xf32> to vector<5x128xf32>
    %14 = arith.mulf %12, %13 : vector<5x128xf32>
    %15 = arith.addf %9, %14 : vector<5x128xf32>
    %c0_6 = arith.constant 0 : index
    %c2 = arith.constant 2 : index
    %16 = vector.load %arg2[%c0_6, %c2] : memref<8x36xf32, #tpu.memory_space<vmem>>, vector<5x1xf32>
    %17 = vector.extract_strided_slice %0 {offsets = [2, 0], sizes = [1, 128], strides = [1, 1]} : vector<6x128xf32> to vector<1x128xf32>
    %18 = vector.broadcast %16 : vector<5x1xf32> to vector<5x128xf32>
    %19 = vector.broadcast %17 : vector<1x128xf32> to vector<5x128xf32>
    %20 = arith.mulf %18, %19 : vector<5x128xf32>
    %21 = arith.addf %15, %20 : vector<5x128xf32>
    %c0_7 = arith.constant 0 : index
    %c3 = arith.constant 3 : index
    %22 = vector.load %arg2[%c0_7, %c3] : memref<8x36xf32, #tpu.memory_space<vmem>>, vector<5x1xf32>
    %23 = vector.extract_strided_slice %0 {offsets = [3, 0], sizes = [1, 128], strides = [1, 1]} : vector<6x128xf32> to vector<1x128xf32>
    %24 = vector.broadcast %22 : vector<5x1xf32> to vector<5x128xf32>
    %25 = vector.broadcast %23 : vector<1x128xf32> to vector<5x128xf32>
    %26 = arith.mulf %24, %25 : vector<5x128xf32>
    %27 = arith.addf %21, %26 : vector<5x128xf32>
    %c0_8 = arith.constant 0 : index
    %c4 = arith.constant 4 : index
    %28 = vector.load %arg2[%c0_8, %c4] : memref<8x36xf32, #tpu.memory_space<vmem>>, vector<5x1xf32>
    %29 = vector.extract_strided_slice %0 {offsets = [4, 0], sizes = [1, 128], strides = [1, 1]} : vector<6x128xf32> to vector<1x128xf32>
    %30 = vector.broadcast %28 : vector<5x1xf32> to vector<5x128xf32>
    %31 = vector.broadcast %29 : vector<1x128xf32> to vector<5x128xf32>
    %32 = arith.mulf %30, %31 : vector<5x128xf32>
    %33 = arith.addf %27, %32 : vector<5x128xf32>
    %c0_9 = arith.constant 0 : index
    %c5 = arith.constant 5 : index
    %34 = vector.load %arg2[%c0_9, %c5] : memref<8x36xf32, #tpu.memory_space<vmem>>, vector<5x1xf32>
    %35 = vector.extract_strided_slice %0 {offsets = [5, 0], sizes = [1, 128], strides = [1, 1]} : vector<6x128xf32> to vector<1x128xf32>
    %36 = vector.broadcast %34 : vector<5x1xf32> to vector<5x128xf32>
    %37 = vector.broadcast %35 : vector<1x128xf32> to vector<5x128xf32>
    %38 = arith.mulf %36, %37 : vector<5x128xf32>
    %39 = arith.addf %33, %38 : vector<5x128xf32>
    %cst = arith.constant 0.00999999977 : f32
    %40 = vector.broadcast %cst : f32 to vector<5x128xf32>
    %41 = arith.mulf %40, %39 : vector<5x128xf32>
    %42 = arith.maximumf %39, %41 : vector<5x128xf32>
    %c0_10 = arith.constant 0 : index
    %c31 = arith.constant 31 : index
    %43 = vector.load %arg2[%c0_10, %c31] : memref<8x36xf32, #tpu.memory_space<vmem>>, vector<5x1xf32>
    %c0_11 = arith.constant 0 : index
    %c6_12 = arith.constant 6 : index
    %44 = vector.load %arg2[%c0_11, %c6_12] : memref<8x36xf32, #tpu.memory_space<vmem>>, vector<5x1xf32>
    %45 = vector.extract_strided_slice %42 {offsets = [0, 0], sizes = [1, 128], strides = [1, 1]} : vector<5x128xf32> to vector<1x128xf32>
    %46 = vector.broadcast %44 : vector<5x1xf32> to vector<5x128xf32>
    %47 = vector.broadcast %45 : vector<1x128xf32> to vector<5x128xf32>
    %48 = arith.mulf %46, %47 : vector<5x128xf32>
    %49 = vector.broadcast %43 : vector<5x1xf32> to vector<5x128xf32>
    %50 = arith.addf %49, %48 : vector<5x128xf32>
    %c0_13 = arith.constant 0 : index
    %c7 = arith.constant 7 : index
    %51 = vector.load %arg2[%c0_13, %c7] : memref<8x36xf32, #tpu.memory_space<vmem>>, vector<5x1xf32>
    %52 = vector.extract_strided_slice %42 {offsets = [1, 0], sizes = [1, 128], strides = [1, 1]} : vector<5x128xf32> to vector<1x128xf32>
    %53 = vector.broadcast %51 : vector<5x1xf32> to vector<5x128xf32>
    %54 = vector.broadcast %52 : vector<1x128xf32> to vector<5x128xf32>
    %55 = arith.mulf %53, %54 : vector<5x128xf32>
    %56 = arith.addf %50, %55 : vector<5x128xf32>
    %c0_14 = arith.constant 0 : index
    %c8 = arith.constant 8 : index
    %57 = vector.load %arg2[%c0_14, %c8] : memref<8x36xf32, #tpu.memory_space<vmem>>, vector<5x1xf32>
    %58 = vector.extract_strided_slice %42 {offsets = [2, 0], sizes = [1, 128], strides = [1, 1]} : vector<5x128xf32> to vector<1x128xf32>
    %59 = vector.broadcast %57 : vector<5x1xf32> to vector<5x128xf32>
    %60 = vector.broadcast %58 : vector<1x128xf32> to vector<5x128xf32>
    %61 = arith.mulf %59, %60 : vector<5x128xf32>
    %62 = arith.addf %56, %61 : vector<5x128xf32>
    %c0_15 = arith.constant 0 : index
    %c9 = arith.constant 9 : index
    %63 = vector.load %arg2[%c0_15, %c9] : memref<8x36xf32, #tpu.memory_space<vmem>>, vector<5x1xf32>
    %64 = vector.extract_strided_slice %42 {offsets = [3, 0], sizes = [1, 128], strides = [1, 1]} : vector<5x128xf32> to vector<1x128xf32>
    %65 = vector.broadcast %63 : vector<5x1xf32> to vector<5x128xf32>
    %66 = vector.broadcast %64 : vector<1x128xf32> to vector<5x128xf32>
    %67 = arith.mulf %65, %66 : vector<5x128xf32>
    %68 = arith.addf %62, %67 : vector<5x128xf32>
    %c0_16 = arith.constant 0 : index
    %c10 = arith.constant 10 : index
    %69 = vector.load %arg2[%c0_16, %c10] : memref<8x36xf32, #tpu.memory_space<vmem>>, vector<5x1xf32>
    %70 = vector.extract_strided_slice %42 {offsets = [4, 0], sizes = [1, 128], strides = [1, 1]} : vector<5x128xf32> to vector<1x128xf32>
    %71 = vector.broadcast %69 : vector<5x1xf32> to vector<5x128xf32>
    %72 = vector.broadcast %70 : vector<1x128xf32> to vector<5x128xf32>
    %73 = arith.mulf %71, %72 : vector<5x128xf32>
    %74 = arith.addf %68, %73 : vector<5x128xf32>
    %cst_17 = arith.constant 0.00999999977 : f32
    %75 = vector.broadcast %cst_17 : f32 to vector<5x128xf32>
    %76 = arith.mulf %75, %74 : vector<5x128xf32>
    %77 = arith.maximumf %74, %76 : vector<5x128xf32>
    %c0_18 = arith.constant 0 : index
    %c32 = arith.constant 32 : index
    %78 = vector.load %arg2[%c0_18, %c32] : memref<8x36xf32, #tpu.memory_space<vmem>>, vector<8x1xf32>
    %c0_19 = arith.constant 0 : index
    %c11 = arith.constant 11 : index
    %79 = vector.load %arg2[%c0_19, %c11] : memref<8x36xf32, #tpu.memory_space<vmem>>, vector<8x1xf32>
    %80 = vector.extract_strided_slice %77 {offsets = [0, 0], sizes = [1, 128], strides = [1, 1]} : vector<5x128xf32> to vector<1x128xf32>
    %81 = vector.broadcast %79 : vector<8x1xf32> to vector<8x128xf32>
    %82 = vector.broadcast %80 : vector<1x128xf32> to vector<8x128xf32>
    %83 = arith.mulf %81, %82 : vector<8x128xf32>
    %84 = vector.broadcast %78 : vector<8x1xf32> to vector<8x128xf32>
    %85 = arith.addf %84, %83 : vector<8x128xf32>
    %c0_20 = arith.constant 0 : index
    %c12 = arith.constant 12 : index
    %86 = vector.load %arg2[%c0_20, %c12] : memref<8x36xf32, #tpu.memory_space<vmem>>, vector<8x1xf32>
    %87 = vector.extract_strided_slice %77 {offsets = [1, 0], sizes = [1, 128], strides = [1, 1]} : vector<5x128xf32> to vector<1x128xf32>
    %88 = vector.broadcast %86 : vector<8x1xf32> to vector<8x128xf32>
    %89 = vector.broadcast %87 : vector<1x128xf32> to vector<8x128xf32>
    %90 = arith.mulf %88, %89 : vector<8x128xf32>
    %91 = arith.addf %85, %90 : vector<8x128xf32>
    %c0_21 = arith.constant 0 : index
    %c13 = arith.constant 13 : index
    %92 = vector.load %arg2[%c0_21, %c13] : memref<8x36xf32, #tpu.memory_space<vmem>>, vector<8x1xf32>
    %93 = vector.extract_strided_slice %77 {offsets = [2, 0], sizes = [1, 128], strides = [1, 1]} : vector<5x128xf32> to vector<1x128xf32>
    %94 = vector.broadcast %92 : vector<8x1xf32> to vector<8x128xf32>
    %95 = vector.broadcast %93 : vector<1x128xf32> to vector<8x128xf32>
    %96 = arith.mulf %94, %95 : vector<8x128xf32>
    %97 = arith.addf %91, %96 : vector<8x128xf32>
    %c0_22 = arith.constant 0 : index
    %c14 = arith.constant 14 : index
    %98 = vector.load %arg2[%c0_22, %c14] : memref<8x36xf32, #tpu.memory_space<vmem>>, vector<8x1xf32>
    %99 = vector.extract_strided_slice %77 {offsets = [3, 0], sizes = [1, 128], strides = [1, 1]} : vector<5x128xf32> to vector<1x128xf32>
    %100 = vector.broadcast %98 : vector<8x1xf32> to vector<8x128xf32>
    %101 = vector.broadcast %99 : vector<1x128xf32> to vector<8x128xf32>
    %102 = arith.mulf %100, %101 : vector<8x128xf32>
    %103 = arith.addf %97, %102 : vector<8x128xf32>
    %c0_23 = arith.constant 0 : index
    %c15 = arith.constant 15 : index
    %104 = vector.load %arg2[%c0_23, %c15] : memref<8x36xf32, #tpu.memory_space<vmem>>, vector<8x1xf32>
    %105 = vector.extract_strided_slice %77 {offsets = [4, 0], sizes = [1, 128], strides = [1, 1]} : vector<5x128xf32> to vector<1x128xf32>
    %106 = vector.broadcast %104 : vector<8x1xf32> to vector<8x128xf32>
    %107 = vector.broadcast %105 : vector<1x128xf32> to vector<8x128xf32>
    %108 = arith.mulf %106, %107 : vector<8x128xf32>
    %109 = arith.addf %103, %108 : vector<8x128xf32>
    %110 = vector.extract_strided_slice %109 {offsets = [0, 0], sizes = [4, 128], strides = [1, 1]} : vector<8x128xf32> to vector<4x128xf32>
    %111 = vector.extract_strided_slice %109 {offsets = [4, 0], sizes = [4, 128], strides = [1, 1]} : vector<8x128xf32> to vector<4x128xf32>
    %cst_24 = arith.constant 5.000000e-01 : f32
    %112 = vector.broadcast %cst_24 : f32 to vector<4x128xf32>
    %113 = arith.mulf %111, %112 : vector<4x128xf32>
    %114 = math.exp %113 : vector<4x128xf32>
    %115 = arith.mulf %1, %114 : vector<4x128xf32>
    %116 = arith.addf %110, %115 : vector<4x128xf32>
    %c0_25 = arith.constant 0 : index
    %c33 = arith.constant 33 : index
    %117 = vector.load %arg2[%c0_25, %c33] : memref<8x36xf32, #tpu.memory_space<vmem>>, vector<5x1xf32>
    %c0_26 = arith.constant 0 : index
    %c16 = arith.constant 16 : index
    %118 = vector.load %arg2[%c0_26, %c16] : memref<8x36xf32, #tpu.memory_space<vmem>>, vector<5x1xf32>
    %119 = vector.extract_strided_slice %116 {offsets = [0, 0], sizes = [1, 128], strides = [1, 1]} : vector<4x128xf32> to vector<1x128xf32>
    %120 = vector.broadcast %118 : vector<5x1xf32> to vector<5x128xf32>
    %121 = vector.broadcast %119 : vector<1x128xf32> to vector<5x128xf32>
    %122 = arith.mulf %120, %121 : vector<5x128xf32>
    %123 = vector.broadcast %117 : vector<5x1xf32> to vector<5x128xf32>
    %124 = arith.addf %123, %122 : vector<5x128xf32>
    %c0_27 = arith.constant 0 : index
    %c17 = arith.constant 17 : index
    %125 = vector.load %arg2[%c0_27, %c17] : memref<8x36xf32, #tpu.memory_space<vmem>>, vector<5x1xf32>
    %126 = vector.extract_strided_slice %116 {offsets = [1, 0], sizes = [1, 128], strides = [1, 1]} : vector<4x128xf32> to vector<1x128xf32>
    %127 = vector.broadcast %125 : vector<5x1xf32> to vector<5x128xf32>
    %128 = vector.broadcast %126 : vector<1x128xf32> to vector<5x128xf32>
    %129 = arith.mulf %127, %128 : vector<5x128xf32>
    %130 = arith.addf %124, %129 : vector<5x128xf32>
    %c0_28 = arith.constant 0 : index
    %c18 = arith.constant 18 : index
    %131 = vector.load %arg2[%c0_28, %c18] : memref<8x36xf32, #tpu.memory_space<vmem>>, vector<5x1xf32>
    %132 = vector.extract_strided_slice %116 {offsets = [2, 0], sizes = [1, 128], strides = [1, 1]} : vector<4x128xf32> to vector<1x128xf32>
    %133 = vector.broadcast %131 : vector<5x1xf32> to vector<5x128xf32>
    %134 = vector.broadcast %132 : vector<1x128xf32> to vector<5x128xf32>
    %135 = arith.mulf %133, %134 : vector<5x128xf32>
    %136 = arith.addf %130, %135 : vector<5x128xf32>
    %c0_29 = arith.constant 0 : index
    %c19 = arith.constant 19 : index
    %137 = vector.load %arg2[%c0_29, %c19] : memref<8x36xf32, #tpu.memory_space<vmem>>, vector<5x1xf32>
    %138 = vector.extract_strided_slice %116 {offsets = [3, 0], sizes = [1, 128], strides = [1, 1]} : vector<4x128xf32> to vector<1x128xf32>
    %139 = vector.broadcast %137 : vector<5x1xf32> to vector<5x128xf32>
    %140 = vector.broadcast %138 : vector<1x128xf32> to vector<5x128xf32>
    %141 = arith.mulf %139, %140 : vector<5x128xf32>
    %142 = arith.addf %136, %141 : vector<5x128xf32>
    %cst_30 = arith.constant 0.000000e+00 : f32
    %143 = vector.broadcast %cst_30 : f32 to vector<5x128xf32>
    %144 = arith.maximumf %142, %143 : vector<5x128xf32>
    %c0_31 = arith.constant 0 : index
    %c34 = arith.constant 34 : index
    %145 = vector.load %arg2[%c0_31, %c34] : memref<8x36xf32, #tpu.memory_space<vmem>>, vector<5x1xf32>
    %c0_32 = arith.constant 0 : index
    %c20 = arith.constant 20 : index
    %146 = vector.load %arg2[%c0_32, %c20] : memref<8x36xf32, #tpu.memory_space<vmem>>, vector<5x1xf32>
    %147 = vector.extract_strided_slice %144 {offsets = [0, 0], sizes = [1, 128], strides = [1, 1]} : vector<5x128xf32> to vector<1x128xf32>
    %148 = vector.broadcast %146 : vector<5x1xf32> to vector<5x128xf32>
    %149 = vector.broadcast %147 : vector<1x128xf32> to vector<5x128xf32>
    %150 = arith.mulf %148, %149 : vector<5x128xf32>
    %151 = vector.broadcast %145 : vector<5x1xf32> to vector<5x128xf32>
    %152 = arith.addf %151, %150 : vector<5x128xf32>
    %c0_33 = arith.constant 0 : index
    %c21 = arith.constant 21 : index
    %153 = vector.load %arg2[%c0_33, %c21] : memref<8x36xf32, #tpu.memory_space<vmem>>, vector<5x1xf32>
    %154 = vector.extract_strided_slice %144 {offsets = [1, 0], sizes = [1, 128], strides = [1, 1]} : vector<5x128xf32> to vector<1x128xf32>
    %155 = vector.broadcast %153 : vector<5x1xf32> to vector<5x128xf32>
    %156 = vector.broadcast %154 : vector<1x128xf32> to vector<5x128xf32>
    %157 = arith.mulf %155, %156 : vector<5x128xf32>
    %158 = arith.addf %152, %157 : vector<5x128xf32>
    %c0_34 = arith.constant 0 : index
    %c22 = arith.constant 22 : index
    %159 = vector.load %arg2[%c0_34, %c22] : memref<8x36xf32, #tpu.memory_space<vmem>>, vector<5x1xf32>
    %160 = vector.extract_strided_slice %144 {offsets = [2, 0], sizes = [1, 128], strides = [1, 1]} : vector<5x128xf32> to vector<1x128xf32>
    %161 = vector.broadcast %159 : vector<5x1xf32> to vector<5x128xf32>
    %162 = vector.broadcast %160 : vector<1x128xf32> to vector<5x128xf32>
    %163 = arith.mulf %161, %162 : vector<5x128xf32>
    %164 = arith.addf %158, %163 : vector<5x128xf32>
    %c0_35 = arith.constant 0 : index
    %c23 = arith.constant 23 : index
    %165 = vector.load %arg2[%c0_35, %c23] : memref<8x36xf32, #tpu.memory_space<vmem>>, vector<5x1xf32>
    %166 = vector.extract_strided_slice %144 {offsets = [3, 0], sizes = [1, 128], strides = [1, 1]} : vector<5x128xf32> to vector<1x128xf32>
    %167 = vector.broadcast %165 : vector<5x1xf32> to vector<5x128xf32>
    %168 = vector.broadcast %166 : vector<1x128xf32> to vector<5x128xf32>
    %169 = arith.mulf %167, %168 : vector<5x128xf32>
    %170 = arith.addf %164, %169 : vector<5x128xf32>
    %c0_36 = arith.constant 0 : index
    %c24 = arith.constant 24 : index
    %171 = vector.load %arg2[%c0_36, %c24] : memref<8x36xf32, #tpu.memory_space<vmem>>, vector<5x1xf32>
    %172 = vector.extract_strided_slice %144 {offsets = [4, 0], sizes = [1, 128], strides = [1, 1]} : vector<5x128xf32> to vector<1x128xf32>
    %173 = vector.broadcast %171 : vector<5x1xf32> to vector<5x128xf32>
    %174 = vector.broadcast %172 : vector<1x128xf32> to vector<5x128xf32>
    %175 = arith.mulf %173, %174 : vector<5x128xf32>
    %176 = arith.addf %170, %175 : vector<5x128xf32>
    %cst_37 = arith.constant 0.000000e+00 : f32
    %177 = vector.broadcast %cst_37 : f32 to vector<5x128xf32>
    %178 = arith.maximumf %176, %177 : vector<5x128xf32>
    %c0_38 = arith.constant 0 : index
    %c35 = arith.constant 35 : index
    %179 = vector.load %arg2[%c0_38, %c35] : memref<8x36xf32, #tpu.memory_space<vmem>>, vector<6x1xf32>
    %c0_39 = arith.constant 0 : index
    %c25 = arith.constant 25 : index
    %180 = vector.load %arg2[%c0_39, %c25] : memref<8x36xf32, #tpu.memory_space<vmem>>, vector<6x1xf32>
    %181 = vector.extract_strided_slice %178 {offsets = [0, 0], sizes = [1, 128], strides = [1, 1]} : vector<5x128xf32> to vector<1x128xf32>
    %182 = vector.broadcast %180 : vector<6x1xf32> to vector<6x128xf32>
    %183 = vector.broadcast %181 : vector<1x128xf32> to vector<6x128xf32>
    %184 = arith.mulf %182, %183 : vector<6x128xf32>
    %185 = vector.broadcast %179 : vector<6x1xf32> to vector<6x128xf32>
    %186 = arith.addf %185, %184 : vector<6x128xf32>
    %c0_40 = arith.constant 0 : index
    %c26 = arith.constant 26 : index
    %187 = vector.load %arg2[%c0_40, %c26] : memref<8x36xf32, #tpu.memory_space<vmem>>, vector<6x1xf32>
    %188 = vector.extract_strided_slice %178 {offsets = [1, 0], sizes = [1, 128], strides = [1, 1]} : vector<5x128xf32> to vector<1x128xf32>
    %189 = vector.broadcast %187 : vector<6x1xf32> to vector<6x128xf32>
    %190 = vector.broadcast %188 : vector<1x128xf32> to vector<6x128xf32>
    %191 = arith.mulf %189, %190 : vector<6x128xf32>
    %192 = arith.addf %186, %191 : vector<6x128xf32>
    %c0_41 = arith.constant 0 : index
    %c27 = arith.constant 27 : index
    %193 = vector.load %arg2[%c0_41, %c27] : memref<8x36xf32, #tpu.memory_space<vmem>>, vector<6x1xf32>
    %194 = vector.extract_strided_slice %178 {offsets = [2, 0], sizes = [1, 128], strides = [1, 1]} : vector<5x128xf32> to vector<1x128xf32>
    %195 = vector.broadcast %193 : vector<6x1xf32> to vector<6x128xf32>
    %196 = vector.broadcast %194 : vector<1x128xf32> to vector<6x128xf32>
    %197 = arith.mulf %195, %196 : vector<6x128xf32>
    %198 = arith.addf %192, %197 : vector<6x128xf32>
    %c0_42 = arith.constant 0 : index
    %c28 = arith.constant 28 : index
    %199 = vector.load %arg2[%c0_42, %c28] : memref<8x36xf32, #tpu.memory_space<vmem>>, vector<6x1xf32>
    %200 = vector.extract_strided_slice %178 {offsets = [3, 0], sizes = [1, 128], strides = [1, 1]} : vector<5x128xf32> to vector<1x128xf32>
    %201 = vector.broadcast %199 : vector<6x1xf32> to vector<6x128xf32>
    %202 = vector.broadcast %200 : vector<1x128xf32> to vector<6x128xf32>
    %203 = arith.mulf %201, %202 : vector<6x128xf32>
    %204 = arith.addf %198, %203 : vector<6x128xf32>
    %c0_43 = arith.constant 0 : index
    %c29 = arith.constant 29 : index
    %205 = vector.load %arg2[%c0_43, %c29] : memref<8x36xf32, #tpu.memory_space<vmem>>, vector<6x1xf32>
    %206 = vector.extract_strided_slice %178 {offsets = [4, 0], sizes = [1, 128], strides = [1, 1]} : vector<5x128xf32> to vector<1x128xf32>
    %207 = vector.broadcast %205 : vector<6x1xf32> to vector<6x128xf32>
    %208 = vector.broadcast %206 : vector<1x128xf32> to vector<6x128xf32>
    %209 = arith.mulf %207, %208 : vector<6x128xf32>
    %210 = arith.addf %204, %209 : vector<6x128xf32>
    %c0_44 = arith.constant 0 : index
    %c0_45 = arith.constant 0 : index
    %211 = vector.load %arg3[%c0_44, %c0_45] : memref<18x128xf32, #tpu.memory_space<vmem>>, vector<4x128xf32>
    tpu.vector_store %arg3[%c0_44, %c0_45], %116 {strides = array<i32>} : memref<18x128xf32, #tpu.memory_space<vmem>>, vector<4x128xf32>,
    %c4_46 = arith.constant 4 : index
    %c0_47 = arith.constant 0 : index
    %212 = vector.load %arg3[%c4_46, %c0_47] : memref<18x128xf32, #tpu.memory_space<vmem>>, vector<8x128xf32>
    tpu.vector_store %arg3[%c4_46, %c0_47], %109 {strides = array<i32>} : memref<18x128xf32, #tpu.memory_space<vmem>>, vector<8x128xf32>,
    %c12_48 = arith.constant 12 : index
    %c0_49 = arith.constant 0 : index
    %213 = vector.load %arg3[%c12_48, %c0_49] : memref<18x128xf32, #tpu.memory_space<vmem>>, vector<6x128xf32>
    tpu.vector_store %arg3[%c12_48, %c0_49], %210 {strides = array<i32>} : memref<18x128xf32, #tpu.memory_space<vmem>>, vector<6x128xf32>,
    return
  }
  func.func @transform_0(%arg0: i32) -> (i32, i32) {
    %c0_i32 = arith.constant 0 : i32
    %c0_i32_0 = arith.constant 0 : i32
    return %c0_i32, %arg0 : i32, i32
  }
  func.func @transform_1(%arg0: i32) -> (i32, i32) {
    %c0_i32 = arith.constant 0 : i32
    %c0_i32_0 = arith.constant 0 : i32
    %c0_i32_1 = arith.constant 0 : i32
    return %c0_i32, %c0_i32_0 : i32, i32
  }
  func.func @transform_2(%arg0: i32) -> (i32, i32) {
    %c0_i32 = arith.constant 0 : i32
    %c0_i32_0 = arith.constant 0 : i32
    return %c0_i32, %arg0 : i32, i32
  }
}

</mosaic_0001>

<bundles_post_ra>
// kernel: vae_linear_1003_forward.2
= control target key start
LH: loop header
LB: loop body
LE: loop exit
PB: predicated region body
PF: predicated region fallthrough
CT: control target
= control target key end

     0   :  { %s494_s9 = smov 0   ;;  %s496_s10 = smov 0   ;;  %s551_s0 = inlined_call_operand.vmem [shape: f32[10,384], index: 0, kind: input, shape index: {}]   ;;  %s552_s1 = inlined_call_operand.vmem [shape: f32[5,7], index: 1, kind: input, shape index: {}]   ;;  %s553_s2 = inlined_call_operand.vmem [shape: f32[3,5,6], index: 2, kind: output, shape index: {}]  }
   0x1   :  { %s498_s11 = smov 0  }
   0x2 LB: > { %s387_s12 = sadd.s32 4294967295, %s468_s11   ;;  %s511_s13 = sadd.s32 1, %s468_s11   ;;  %s468_s11 = sphi %s498_s11, %s556_s11   ;;  %s464_s10 = sphi %s496_s10, %s555_s10   ;;  %s460_s9 = sphi %s494_s9, %s554_s9  }
   0x3   : > { %s16_s14 = ssub.s32 %s468_s11, %s511_s13  ;;  %s19_s15 = sadd.s32 1, %s464_s10 }
   0x4   : > { %p17_p0 = scmp.eq.s32.totalorder %s16_s14, 0  ;;  %p26_p1 = scmp.ne.s32.totalorder %s464_s10, %s460_s9 }
   0x5   : > { %p27_p2 = scmp.eq.s32.totalorder %s468_s11, 0  ;;  %p390_p4 = scmp.ge.s32.totalorder %s468_s11, 3 }
   0x6   : > { %s520_s16 = scalar_select %p17_p0, %s464_s10, %s19_s15  }
   0x7   : > { %p28_p3 = por %p27_p2, %p26_p1  ;;  %102 = sbr.rel (%p390_p4) target bundleno = 17 (0x11), region = 20 }
   0xc   : > { %105 = sbr.rel (!%p28_p3) target bundleno = 17 (0x11), region = 24  ;;  %s107_s17 = sand.u32 (%p28_p3), 1, %s464_s10  }
   0xd   : > { %s392_s18 = sshll.u32 (%p28_p3), %s468_s11, 3  ;;  %s391_s19 = sshll.u32 (%p28_p3), %s107_s17, 4 }
   0xe   : > { %s111_s22 = scalar_lea.vmem (%p28_p3), %s551_s0, %s392_s18  ;;  %s109_s23 = scalar_lea.vmem (%p28_p3), [#allocation2], %s391_s19 }
   0xf   : > { %v142_v0 = vld [vmem:[%s111_s22] sm:$0xff] (%p28_p3)  ;;  %v144_v1 = vld [vmem:[%s111_s22 + $0x18] sm:$0xff] (%p28_p3) }
  0x10   : > { %143 = vst [vmem:[%s109_s23] sm:$0xff] (%p28_p3), %v142_v0  ;;  %145 = vst [vmem:[%s109_s23 + $0x8] sm:$0xff] (%p28_p3), %v144_v1 }
  0x11 PF: > { %p393_p5 = scmp.ge.s32.totalorder %s468_s11, 1  ;;  %p150_p6 = scmp.lt.s32.totalorder %s468_s11, 4 }
  0x13   : > { %p151_p7 = pnand %p393_p5, %p150_p6 }
  0x14   : > { %s157_s26 = sand.u32 (!%p151_p7), 1, %s460_s9   ;;  %p177_p8 = scmp.lt.s32.totalorder (!%p151_p7), %s387_s12, 2 }
  0x15   : > { %154 = sbr.rel (%p151_p7) target bundleno = 373 (0x175), region = 62  ;;  %s394_s27 = sshll.u32 (!%p151_p7), %s157_s26, 4 }
  0x16   : > { %s159_s28 = scalar_lea.vmem (!%p151_p7), [#allocation2], %s394_s27 }
  0x1a   : > { %v182_v2 = vld [vmem:[%s552_s1] sm:$0x1f]  ;;  %v470_v3 = vmov 1   ;;  %v471_v4 = vmov 0   ;;  %v472_v5 = vmov 2   ;;  %v473_v6 = vmov 6  }
  0x1b   : > { %440 = vset.pattern.permute.xlu1 %v470_v3  ;;  %438 = vset.pattern.permute.xlu0 %v471_v4  ;;  %v474_v7 = vmov 3   ;;  %v475_v8 = vmov 4   ;;  %v476_v9 = vmov 5   ;;  %v477_v10 = vmov 0.0   ;;  %v181_v14 = vld [vmem:[%s159_s28] sm:$0x3f] }
  0x1c   : > { %199 = vperm.xlu1 %440, %v182_v2   ;;  %185 = vperm.xlu0 %438, %v182_v2   ;;  %vm478_vm0 = vmmov 0   ;;  %v188_v11 = vlaneseq  ;;  %vm320_vm1 = vcmask 1044480   ;;  %s558_s12 = smov (!%p177_p8, %s387_s12), 2  ;;  %vm324_vm2 = vcmask 39936  }
  0x1d   : > { %400 = vmatprep.subr.mxu0 %v477_v10  ;;  %402 = vmatprep.mubr.msk.f32.mxu0 %vm478_vm0, %v477_v10  ;;  %s395_s29 = sshll.u32 %s558_s12, 3  ;;  %vm326_vm3 = vcmask 45056  }
  0x1e   : > { %v189_v12 = vshrl.u32 %v188_v11, 7  ;;  %s180_s4 = scalar_lea.vmem %s553_s2, %s395_s29 }
  0x20   : > { %441 = vset.pattern.permute.xlu1 %v472_v5  ;;  %439 = vset.pattern.permute.xlu0 %v473_v6  ;;  %v190_v13 = vsub.s32 0, %v189_v12  ;;  %v204_v15 = vsub.s32 1, %v189_v12  ;;  %v214_v19 = vsub.s32 2, %v189_v12  ;;  %v224_v22 = vsub.s32 3, %v189_v12 }
  0x21   : > { %209 = vperm.xlu1 %441, %v182_v2   ;;  %194 = vperm.xlu0 %439, %v182_v2   ;;  %v234_v23 = vsub.s32 4, %v189_v12  ;;  %v244_v33 = vsub.s32 5, %v189_v12 }
  0x22   : > { %v191_v16 = vrot.slane %v181_v14, %v190_v13  ;;  %v205_v20 = vrot.slane %v181_v14, %v204_v15  ;;  %v215_v24 = vrot.slane %v181_v14, %v214_v19  ;;  %v225_v29 = vrot.slane %v181_v14, %v224_v22 }
  0x23   : > { %v235_v30 = vrot.slane %v181_v14, %v234_v23  ;;  %v245_v39 = vrot.slane %v181_v14, %v244_v33 }
  0x25   : > { %442 = vset.pattern.permute.xlu1 %v474_v7  ;;  %443 = vset.pattern.permute.xlu0 %v475_v8 }
  0x26   : > { %219 = vperm.xlu1 %442, %v182_v2   ;;  %229 = vperm.xlu0 %443, %v182_v2  }
  0x2a   : > { %444 = vset.pattern.permute.xlu1 %v476_v9  ;;  %445 = vset.pattern.permute.xlu0 %v476_v9 }
  0x2b   : > { %239 = vperm.xlu1 %444, %v182_v2  }
  0x97   : > { %v200_v17 = vpop.permute.xlu1 %199  ;;  %v186_v18 = vpop.permute.xlu0 %185 }
  0x98   : > { %v192_v21 = vmul.f32 %v191_v16, %v186_v18  ;;  %v206_v27 = vmul.f32 %v205_v20, %v200_v17 }
  0x9c   : > { %v210_v25 = vpop.permute.xlu1 %209  ;;  %v195_v26 = vpop.permute.xlu0 %194 }
  0x9d   : > { %v197_v28 = vadd.f32 %v195_v26, %v192_v21  ;;  %v216_v31 = vmul.f32 %v215_v24, %v210_v25 }
  0x9f   : > { %v207_v32 = vadd.f32 %v206_v27, %v197_v28 }
  0xa1   : > { %v220_v34 = vpop.permute.xlu1 %219  ;;  %v217_v35 = vadd.f32 %v216_v31, %v207_v32  ;;  %v230_v36 = vpop.permute.xlu0 %229 }
  0xa2   : > { %v226_v37 = vmul.f32 %v225_v29, %v220_v34  ;;  %v236_v38 = vmul.f32 %v235_v30, %v230_v36 }
  0xa4   : > { %v227_v40 = vadd.f32 %v226_v37, %v217_v35 }
  0xa6   : > { %v237_v41 = vadd.f32 %v236_v38, %v227_v40  ;;  %v240_v42 = vpop.permute.xlu1 %239 }
  0xa7   : > { %v246_v43 = vmul.f32 %v245_v39, %v240_v42 }
  0xa9   : > { %v247_v44 = vadd.f32 %v246_v43, %v237_v41 }
  0xab   : > { %v248_v45 = vmul.f32 0.01, %v247_v44 }
  0xad   : > { %v249_v46 = vmax.f32 %v247_v44, %v248_v45 }
  0xaf   : > { %401 = vmatpush3.xpose.msra.mxu0 %v249_v46  ;;  %v321_v47 = vsel %vm320_vm1, %v249_v46, 0.0 }
  0xb0   : > { %322 = vadd.xlane.f32.xlu1 %v321_v47 }
  0xb2   : > { %403 = vmatmul.mubr.f32.vlgmr.msra.gmra.mxu0 %v249_v46 }
 0x139   : > { %v323_v48 = vpop.xlane.xlu1 %322 }
 0x172   : > { %v316_v49 = vpop.f32.mrf.mxu0 }
 0x173   : > { %v325_v50 = vsel %vm324_vm2, %v316_v49, %v323_v48 }
 0x174   : > { %327 = vst.msk [vmem:[%s180_s4] sm:$0x1f] %vm326_vm3, %v325_v50  ;;  %v404_v51 = vpop.f32.mrf.mxu0 }
 0x175 PF: > { %p9_p9 = scmp.ge.s32.totalorder %s511_s13, 5   ;;  %s554_s9 = smov %s464_s10 }
 0x176   : > { %s555_s10 = smov %s520_s16  ;;  %s556_s11 = smov %s511_s13 }
 0x177   :  { %11 = sbr.rel (!%p9_p9) target bundleno = 2 (0x2), region = 101 }

// kernel: vae_linear_1003_forward.3
= control target key start
LH: loop header
LB: loop body
LE: loop exit
PB: predicated region body
PF: predicated region fallthrough
CT: control target
= control target key end

     0   :  { %s817_s9 = smov 0   ;;  %s819_s10 = smov 0   ;;  %s970_s0 = inlined_call_operand.vmem [shape: f32[10,384], index: 0, kind: input, shape index: {}]   ;;  %s971_s1 = inlined_call_operand.vmem [shape: f32[8,36], index: 1, kind: input, shape index: {}]   ;;  %s972_s2 = inlined_call_operand.vmem [shape: f32[18,384], index: 2, kind: output, shape index: {}]  }
   0x1   :  { %s821_s11 = smov 0  }
   0x2 LB: > { %s632_s12 = sadd.s32 4294967295, %s764_s11   ;;  %s834_s13 = sadd.s32 1, %s764_s11   ;;  %s764_s11 = sphi %s821_s11, %s976_s11   ;;  %s760_s10 = sphi %s819_s10, %s975_s10   ;;  %s756_s9 = sphi %s817_s9, %s974_s9  }
   0x3   : > { %s16_s14 = ssub.s32 %s764_s11, %s834_s13  ;;  %s19_s15 = sadd.s32 1, %s760_s10 }
   0x4   : > { %p17_p0 = scmp.eq.s32.totalorder %s16_s14, 0  ;;  %p26_p1 = scmp.ne.s32.totalorder %s760_s10, %s756_s9 }
   0x5   : > { %p27_p2 = scmp.eq.s32.totalorder %s764_s11, 0  ;;  %p77_p3 = scmp.eq.s32.totalorder %s632_s12, 2 }
   0x6   : > { %s845_s16 = scalar_select %p17_p0, %s760_s10, %s19_s15  }
   0x7   : > { %p28_p4 = por %p27_p2, %p26_p1  ;;  %p847_p5 = por %p77_p3, %p26_p1 }
   0x8   : > { %p635_p6 = scmp.ge.s32.totalorder %s764_s11, 3 }
   0xa   : > { %102 = sbr.rel (%p635_p6) target bundleno = 20 (0x14), region = 20 }
   0xf   : > { %105 = sbr.rel (!%p28_p4) target bundleno = 20 (0x14), region = 24  ;;  %s107_s18 = sand.u32 (%p28_p4), 1, %s760_s10  }
  0x10   : > { %s637_s19 = sshll.u32 (%p28_p4), %s764_s11, 3  ;;  %s636_s20 = sshll.u32 (%p28_p4), %s107_s18, 4 }
  0x11   : > { %s111_s23 = scalar_lea.vmem (%p28_p4), %s970_s0, %s637_s19  ;;  %s109_s24 = scalar_lea.vmem (%p28_p4), [#allocation2], %s636_s20 }
  0x12   : > { %v142_v0 = vld [vmem:[%s111_s23] sm:$0xff] (%p28_p4)  ;;  %v144_v1 = vld [vmem:[%s111_s23 + $0x18] sm:$0xff] (%p28_p4) }
  0x13   : > { %143 = vst [vmem:[%s109_s24] sm:$0xff] (%p28_p4), %v142_v0  ;;  %145 = vst [vmem:[%s109_s24 + $0x8] sm:$0xff] (%p28_p4), %v144_v1 }
  0x14 PF: > { %p638_p7 = scmp.ge.s32.totalorder %s764_s11, 1  ;;  %p150_p8 = scmp.lt.s32.totalorder %s764_s11, 4 }
  0x16   : > { %p151_p9 = pnand %p638_p7, %p150_p8 }
  0x17   : > { %s157_s3 = sand.u32 (!%p151_p9), 1, %s756_s9  }
  0x18   : > { %154 = sbr.rel (%p151_p9) target bundleno = 291 (0x123), region = 62  ;;  %s897_s4 = sshll.u32 (!%p151_p9), %s157_s3, 4 }
  0x19   : > { %s159_s5 = scalar_lea.vmem (!%p151_p9), [#allocation2], %s897_s4  ;;  %s643_s6 = smul.u32 (!%p151_p9), 24, %s157_s3 }
  0x1b   : > { %s929_s7 = scalar_lea.vmem (!%p151_p9), [#allocation3], %s643_s6 }
  0x1d   : > { %v862_v2 = vld [vmem:[%s971_s1] sm:$0x1f]  ;;  %v766_v3 = vmov 1   ;;  %v767_v4 = vmov 0   ;;  %v768_v5 = vmov 2   ;;  %v769_v6 = vmov 30  }
  0x1e   : > { %706 = vset.pattern.permute.xlu1 %v766_v3  ;;  %704 = vset.pattern.permute.xlu0 %v767_v4  ;;  %v770_v7 = vmov 3   ;;  %v771_v8 = vmov 4   ;;  %v772_v9 = vmov 5   ;;  %v773_v10 = vmov 31   ;;  %v303_v13 = vld [vmem:[%s971_s1] sm:$0xff]  ;;  %s640_s8 = sshll.u32 (%p847_p5), %s632_s12, 3 }
  0x1f   : > { %196 = vperm.xlu1 %706, %v862_v2   ;;  %182 = vperm.xlu0 %704, %v862_v2   ;;  %v774_v11 = vmov 6   ;;  %v775_v12 = vmov 9   ;;  %v776_v14 = vmov 7   ;;  %v777_v15 = vmov 32   ;;  %v467_v27 = vld [vmem:[%s971_s1] sm:$0x3f]  ;;  %s534_s15 = scalar_lea.vmem (%p847_p5), %s972_s2, %s640_s8 }
  0x20   : > { %v778_v16 = vmov 8   ;;  %v779_v17 = vmov 14   ;;  %v780_v18 = vmov 10   ;;  %v781_v19 = vmov 33   ;;  %v177_v44 = vld [vmem:[%s159_s5] sm:$0x3f] }
  0x21   : > { %v782_v20 = vmov 11   ;;  %v783_v21 = vmov 19   ;;  %v784_v22 = vmov 12   ;;  %v785_v23 = vmov 21  }
  0x22   : > { %v786_v24 = vmov 13   ;;  %v787_v25 = vmov 24   ;;  %v788_v26 = vmov 15   ;;  %v789_v28 = vmov 26  }
  0x23   : > { %707 = vset.pattern.permute.xlu1 %v768_v5  ;;  %705 = vset.pattern.permute.xlu0 %v769_v6  ;;  %v790_v29 = vmov 16   ;;  %v791_v30 = vmov 29   ;;  %v792_v31 = vmov 17   ;;  %v793_v32 = vmov 18  }
  0x24   : > { %206 = vperm.xlu1 %707, %v862_v2   ;;  %191 = vperm.xlu0 %705, %v862_v2   ;;  %v794_v33 = vmov 20   ;;  %v795_v34 = vmov 34   ;;  %v796_v35 = vmov 22   ;;  %v797_v36 = vmov 23  }
  0x25   : > { %v798_v37 = vmov 25   ;;  %v799_v38 = vmov 35   ;;  %v800_v39 = vmov 27   ;;  %v801_v40 = vmov 28  }
  0x26   : > { %v185_v41 = vlaneseq }
  0x28   : > { %708 = vset.pattern.permute.xlu1 %v770_v7  ;;  %709 = vset.pattern.permute.xlu0 %v771_v8  ;;  %v186_v42 = vshrl.u32 %v185_v41, 7 }
  0x29   : > { %216 = vperm.xlu1 %708, %v862_v2   ;;  %226 = vperm.xlu0 %709, %v862_v2  }
  0x2a   : > { %v899_v43 = vsub.s32 0, %v186_v42  ;;  %v904_v45 = vsub.s32 1, %v186_v42  ;;  %v907_v49 = vsub.s32 2, %v186_v42  ;;  %v910_v52 = vsub.s32 3, %v186_v42 }
  0x2b   : > { %v912_v53 = vsub.s32 4, %v186_v42  ;;  %v241_v63 = vsub.s32 5, %v186_v42 }
  0x2c   : > { %v188_v46 = vrot.slane %v177_v44, %v899_v43  ;;  %v202_v50 = vrot.slane %v177_v44, %v904_v45  ;;  %v212_v54 = vrot.slane %v177_v44, %v907_v49  ;;  %v222_v59 = vrot.slane %v177_v44, %v910_v52 }
  0x2d   : > { %710 = vset.pattern.permute.xlu1 %v772_v9  ;;  %712 = vset.pattern.permute.xlu0 %v773_v10  ;;  %v232_v60 = vrot.slane %v177_v44, %v912_v53  ;;  %v242_v5 = vrot.slane %v177_v44, %v241_v63 }
  0x2e   : > { %236 = vperm.xlu1 %710, %v862_v2   ;;  %257 = vperm.xlu0 %712, %v862_v2  }
  0x32   : > { %711 = vset.pattern.permute.xlu1 %v774_v11  ;;  %715 = vset.pattern.permute.xlu0 %v775_v12 }
  0x33   : > { %248 = vperm.xlu1 %711, %v862_v2   ;;  %282 = vperm.xlu0 %715, %v862_v2  }
  0x37   : > { %713 = vset.pattern.permute.xlu1 %v776_v14  ;;  %718 = vset.pattern.permute.xlu0 %v777_v15 }
  0x38   : > { %262 = vperm.xlu1 %713, %v862_v2   ;;  %315 = vperm.xlu0 %718, %v303_v13  }
  0x3c   : > { %714 = vset.pattern.permute.xlu1 %v778_v16  ;;  %721 = vset.pattern.permute.xlu0 %v779_v17 }
  0x3d   : > { %272 = vperm.xlu1 %714, %v862_v2   ;;  %340 = vperm.xlu0 %721, %v303_v13  }
  0x41   : > { %716 = vset.pattern.permute.xlu1 %v780_v18  ;;  %724 = vset.pattern.permute.xlu0 %v781_v19 }
  0x42   : > { %292 = vperm.xlu1 %716, %v862_v2   ;;  %377 = vperm.xlu0 %724, %v862_v2  }
  0x46   : > { %717 = vset.pattern.permute.xlu1 %v782_v20  ;;  %727 = vset.pattern.permute.xlu0 %v783_v21 }
  0x47   : > { %306 = vperm.xlu1 %717, %v303_v13   ;;  %402 = vperm.xlu0 %727, %v862_v2  }
  0x4b   : > { %719 = vset.pattern.permute.xlu1 %v784_v22  ;;  %730 = vset.pattern.permute.xlu0 %v785_v23 }
  0x4c   : > { %320 = vperm.xlu1 %719, %v303_v13   ;;  %427 = vperm.xlu0 %730, %v862_v2  }
  0x50   : > { %720 = vset.pattern.permute.xlu1 %v786_v24  ;;  %733 = vset.pattern.permute.xlu0 %v787_v25 }
  0x51   : > { %330 = vperm.xlu1 %720, %v303_v13   ;;  %457 = vperm.xlu0 %733, %v862_v2  }
  0x55   : > { %722 = vset.pattern.permute.xlu1 %v788_v26  ;;  %736 = vset.pattern.permute.xlu0 %v789_v28 }
  0x56   : > { %350 = vperm.xlu1 %722, %v303_v13   ;;  %484 = vperm.xlu0 %736, %v467_v27  }
  0x5a   : > { %723 = vset.pattern.permute.xlu1 %v790_v29  ;;  %739 = vset.pattern.permute.xlu0 %v791_v30 }
  0x5b   : > { %368 = vperm.xlu1 %723, %v862_v2   ;;  %514 = vperm.xlu0 %739, %v467_v27  }
  0x5f   : > { %725 = vset.pattern.permute.xlu1 %v792_v31 }
  0x60   : > { %382 = vperm.xlu1 %725, %v862_v2  }
  0x64   : > { %726 = vset.pattern.permute.xlu1 %v793_v32 }
  0x65   : > { %392 = vperm.xlu1 %726, %v862_v2  }
  0x69   : > { %728 = vset.pattern.permute.xlu1 %v794_v33 }
  0x6a   : > { %413 = vperm.xlu1 %728, %v862_v2  }
  0x6e   : > { %729 = vset.pattern.permute.xlu1 %v795_v34 }
  0x6f   : > { %422 = vperm.xlu1 %729, %v862_v2  }
  0x73   : > { %731 = vset.pattern.permute.xlu1 %v796_v35 }
  0x74   : > { %437 = vperm.xlu1 %731, %v862_v2  }
  0x78   : > { %732 = vset.pattern.permute.xlu1 %v797_v36 }
  0x79   : > { %447 = vperm.xlu1 %732, %v862_v2  }
  0x7d   : > { %734 = vset.pattern.permute.xlu1 %v798_v37 }
  0x7e   : > { %470 = vperm.xlu1 %734, %v467_v27  }
  0x82   : > { %735 = vset.pattern.permute.xlu1 %v799_v38 }
  0x83   : > { %479 = vperm.xlu1 %735, %v467_v27  }
  0x87   : > { %737 = vset.pattern.permute.xlu1 %v800_v39 }
  0x88   : > { %494 = vperm.xlu1 %737, %v467_v27  }
  0x8c   : > { %738 = vset.pattern.permute.xlu1 %v801_v40 }
  0x8d   : > { %504 = vperm.xlu1 %738, %v467_v27  }
  0x9a   : > { %v197_v47 = vpop.permute.xlu1 %196  ;;  %v183_v48 = vpop.permute.xlu0 %182 }
  0x9b   : > { %v189_v51 = vmul.f32 %v188_v46, %v183_v48  ;;  %v203_v57 = vmul.f32 %v202_v50, %v197_v47 }
  0x9f   : > { %v207_v55 = vpop.permute.xlu1 %206  ;;  %v192_v56 = vpop.permute.xlu0 %191 }
  0xa0   : > { %v194_v58 = vadd.f32 %v192_v56, %v189_v51  ;;  %v213_v61 = vmul.f32 %v212_v54, %v207_v55 }
  0xa2   : > { %v204_v62 = vadd.f32 %v203_v57, %v194_v58 }
  0xa4   : > { %v217_v0 = vpop.permute.xlu1 %216  ;;  %v214_v1 = vadd.f32 %v213_v61, %v204_v62  ;;  %v227_v2 = vpop.permute.xlu0 %226 }
  0xa5   : > { %v223_v3 = vmul.f32 %v222_v59, %v217_v0  ;;  %v233_v4 = vmul.f32 %v232_v60, %v227_v2 }
  0xa7   : > { %v224_v6 = vadd.f32 %v223_v3, %v214_v1 }
  0xa9   : > { %v234_v7 = vadd.f32 %v233_v4, %v224_v6  ;;  %v237_v8 = vpop.permute.xlu1 %236  ;;  %v258_v15 = vpop.permute.xlu0 %257  ;;  %v178_v4 = vld [vmem:[%s159_s5 + $0x6] sm:$0xf] }
  0xaa   : > { %v243_v9 = vmul.f32 %v242_v5, %v237_v8 }
  0xac   : > { %v244_v10 = vadd.f32 %v243_v9, %v234_v7 }
  0xae   : > { %v245_v11 = vmul.f32 0.01, %v244_v10  ;;  %v249_v12 = vpop.permute.xlu1 %248  ;;  %v283_v24 = vpop.permute.xlu0 %282 }
  0xb0   : > { %v246_v13 = vmax.f32 %v244_v10, %v245_v11 }
  0xb2   : > { %v254_v14 = vrot.slane %v246_v13, %v899_v43  ;;  %v268_v16 = vrot.slane %v246_v13, %v904_v45  ;;  %v288_v21 = vrot.slane %v246_v13, %v910_v52  ;;  %v278_v22 = vrot.slane %v246_v13, %v907_v49 }
  0xb3   : > { %v263_v17 = vpop.permute.xlu1 %262  ;;  %v298_v29 = vrot.slane %v246_v13, %v912_v53  ;;  %v316_v38 = vpop.permute.xlu0 %315 }
  0xb4   : > { %v255_v18 = vmul.f32 %v254_v14, %v249_v12  ;;  %v269_v20 = vmul.f32 %v268_v16, %v263_v17  ;;  %v289_v27 = vmul.f32 %v288_v21, %v283_v24 }
  0xb6   : > { %v260_v19 = vadd.f32 %v258_v15, %v255_v18 }
  0xb8   : > { %v270_v23 = vadd.f32 %v269_v20, %v260_v19  ;;  %v273_v25 = vpop.permute.xlu1 %272  ;;  %v341_v50 = vpop.permute.xlu0 %340 }
  0xb9   : > { %v279_v26 = vmul.f32 %v278_v22, %v273_v25 }
  0xbb   : > { %v280_v28 = vadd.f32 %v279_v26, %v270_v23 }
  0xbd   : > { %v293_v30 = vpop.permute.xlu1 %292  ;;  %v290_v31 = vadd.f32 %v289_v27, %v280_v28  ;;  %v378_v9 = vpop.permute.xlu0 %377 }
  0xbe   : > { %v299_v32 = vmul.f32 %v298_v29, %v293_v30 }
  0xc0   : > { %v300_v33 = vadd.f32 %v299_v32, %v290_v31 }
  0xc2   : > { %v301_v34 = vmul.f32 0.01, %v300_v33  ;;  %v307_v35 = vpop.permute.xlu1 %306  ;;  %v403_v18 = vpop.permute.xlu0 %402 }
  0xc4   : > { %v302_v36 = vmax.f32 %v300_v33, %v301_v34 }
  0xc6   : > { %v312_v37 = vrot.slane %v302_v36, %v899_v43  ;;  %v326_v39 = vrot.slane %v302_v36, %v904_v45  ;;  %v346_v46 = vrot.slane %v302_v36, %v910_v52  ;;  %v336_v47 = vrot.slane %v302_v36, %v907_v49 }
  0xc7   : > { %v321_v40 = vpop.permute.xlu1 %320  ;;  %v356_v57 = vrot.slane %v302_v36, %v912_v53  ;;  %v428_v29 = vpop.permute.xlu0 %427 }
  0xc8   : > { %v313_v41 = vmul.f32 %v312_v37, %v307_v35  ;;  %v327_v44 = vmul.f32 %v326_v39, %v321_v40  ;;  %v347_v55 = vmul.f32 %v346_v46, %v341_v50 }
  0xca   : > { %v318_v42 = vadd.f32 %v316_v38, %v313_v41 }
  0xcc   : > { %v328_v48 = vadd.f32 %v327_v44, %v318_v42  ;;  %v331_v51 = vpop.permute.xlu1 %330  ;;  %v458_v39 = vpop.permute.xlu0 %457 }
  0xcd   : > { %v337_v54 = vmul.f32 %v336_v47, %v331_v51 }
  0xcf   : > { %v338_v56 = vadd.f32 %v337_v54, %v328_v48 }
  0xd1   : > { %v351_v58 = vpop.permute.xlu1 %350  ;;  %v348_v59 = vadd.f32 %v347_v55, %v338_v56  ;;  %v485_v55 = vpop.permute.xlu0 %484 }
  0xd2   : > { %v357_v60 = vmul.f32 %v356_v57, %v351_v58 }
  0xd4   : > { %v358_v61 = vadd.f32 %v357_v60, %v348_v59 }
  0xd6   : > { %v359_v62 = vmul.f32 0.5, %v358_v61  ;;  %v369_v63 = vpop.permute.xlu1 %368  ;;  %524 = vst [vmem:[%s929_s7 + $0x4] sm:$0xff] %v358_v61 }
  0xd8   : > { %v360_v0 = vmul.f32 1.442695, %v359_v62 }
  0xda   : > { %740 = vpow2.f32 %v360_v0 }
  0xdb   : > { %v383_v1 = vpop.permute.xlu1 %382 }
  0xe0   : > { %v393_v2 = vpop.permute.xlu1 %392 }
  0xe5   : > { %v414_v5 = vpop.permute.xlu1 %413 }
  0xe7   : > { %v741_v3 = vpop.eup %740 }
  0xe8   : > { %v363_v6 = vrot.slane %v741_v3, 4 }
  0xea   : > { %v365_v7 = vmul.f32 %v363_v6, %v178_v4  ;;  %v423_v10 = vpop.permute.xlu1 %422 }
  0xec   : > { %v366_v8 = vadd.f32 %v365_v7, %v358_v61 }
  0xee   : > { %v374_v11 = vrot.slane %v366_v8, %v899_v43  ;;  %v388_v12 = vrot.slane %v366_v8, %v904_v45  ;;  %523 = vst [vmem:[%s929_s7] sm:$0xf] %v366_v8  ;;  %v398_v14 = vrot.slane %v366_v8, %v907_v49  ;;  %v408_v17 = vrot.slane %v366_v8, %v910_v52 }
  0xef   : > { %v438_v19 = vpop.permute.xlu1 %437 }
  0xf0   : > { %v375_v13 = vmul.f32 %v374_v11, %v369_v63  ;;  %v389_v15 = vmul.f32 %v388_v12, %v383_v1  ;;  %v399_v20 = vmul.f32 %v398_v14, %v393_v2  ;;  %v409_v23 = vmul.f32 %v408_v17, %v403_v18  ;;  %v515_v1 = vpop.permute.xlu0 %514 }
  0xf2   : > { %v380_v16 = vadd.f32 %v378_v9, %v375_v13 }
  0xf4   : > { %v390_v21 = vadd.f32 %v389_v15, %v380_v16  ;;  %v448_v25 = vpop.permute.xlu1 %447 }
  0xf6   : > { %v400_v22 = vadd.f32 %v399_v20, %v390_v21 }
  0xf8   : > { %v410_v24 = vadd.f32 %v409_v23, %v400_v22 }
  0xf9   : > { %v471_v32 = vpop.permute.xlu1 %470 }
  0xfa   : > { %v411_v26 = vmax.f32 %v410_v24, 0.0 }
  0xfc   : > { %v419_v27 = vrot.slane %v411_v26, %v899_v43  ;;  %v433_v28 = vrot.slane %v411_v26, %v904_v45  ;;  %v443_v31 = vrot.slane %v411_v26, %v907_v49  ;;  %v453_v35 = vrot.slane %v411_v26, %v910_v52 }
  0xfd   : > { %v463_v38 = vrot.slane %v411_v26, %v912_v53 }
  0xfe   : > { %v420_v30 = vmul.f32 %v419_v27, %v414_v5  ;;  %v434_v34 = vmul.f32 %v433_v28, %v428_v29  ;;  %v444_v36 = vmul.f32 %v443_v31, %v438_v19  ;;  %v454_v41 = vmul.f32 %v453_v35, %v448_v25  ;;  %v480_v42 = vpop.permute.xlu1 %479 }
  0xff   : > { %v464_v46 = vmul.f32 %v463_v38, %v458_v39 }
 0x100   : > { %v425_v33 = vadd.f32 %v423_v10, %v420_v30 }
 0x102   : > { %v435_v37 = vadd.f32 %v434_v34, %v425_v33 }
 0x103   : > { %v495_v50 = vpop.permute.xlu1 %494 }
 0x104   : > { %v445_v40 = vadd.f32 %v444_v36, %v435_v37 }
 0x106   : > { %v455_v44 = vadd.f32 %v454_v41, %v445_v40 }
 0x108   : > { %v465_v47 = vadd.f32 %v464_v46, %v455_v44  ;;  %v505_v61 = vpop.permute.xlu1 %504 }
 0x10a   : > { %v466_v48 = vmax.f32 %v465_v47, 0.0 }
 0x10c   : > { %v476_v51 = vrot.slane %v466_v48, %v899_v43  ;;  %v490_v54 = vrot.slane %v466_v48, %v904_v45  ;;  %v500_v57 = vrot.slane %v466_v48, %v907_v49  ;;  %v510_v60 = vrot.slane %v466_v48, %v910_v52  ;;  %v567_v49 = vld [vmem:[%s929_s7] sm:$0xff] (%p847_p5) }
 0x10d   : > { %v520_v0 = vrot.slane %v466_v48, %v912_v53  ;;  %568 = vst [vmem:[%s534_s15] sm:$0xff] (%p847_p5), %v567_v49 }
 0x10e   : > { %v477_v56 = vmul.f32 %v476_v51, %v471_v32  ;;  %v491_v59 = vmul.f32 %v490_v54, %v485_v55  ;;  %v501_v62 = vmul.f32 %v500_v57, %v495_v50  ;;  %v511_v3 = vmul.f32 %v510_v60, %v505_v61 }
 0x10f   : > { %v521_v4 = vmul.f32 %v520_v0, %v515_v1 }
 0x110   : > { %v482_v58 = vadd.f32 %v480_v42, %v477_v56 }
 0x112   : > { %v492_v63 = vadd.f32 %v491_v59, %v482_v58 }
 0x114   : > { %v502_v2 = vadd.f32 %v501_v62, %v492_v63 }
 0x116   : > { %v512_v43 = vadd.f32 %v511_v3, %v502_v2  ;;  %532 = sbr.rel (!%p847_p5) target bundleno = 291 (0x123), region = 70 }
 0x118   : > { %v522_v45 = vadd.f32 %v521_v4, %v512_v43 }
 0x11a   : > { %525 = vst [vmem:[%s929_s7 + $0xc] sm:$0x3f] %v522_v45 }
 0x121   : > { %v569_v52 = vld [vmem:[%s929_s7 + $0x8] sm:$0xff]  ;;  %v571_v5 = vld [vmem:[%s929_s7 + $0x10] sm:$0xff] }
 0x122   : > { %570 = vst [vmem:[%s534_s15 + $0x18] sm:$0xff] %v569_v52  ;;  %572 = vst [vmem:[%s534_s15 + $0x30] sm:$0xff] %v571_v5 }
 0x123 PF: > { %p9_p10 = scmp.ge.s32.totalorder %s834_s13, 5   ;;  %s974_s9 = smov %s760_s10 }
 0x124   : > { %s975_s10 = smov %s845_s16  ;;  %s976_s11 = smov %s834_s13 }
 0x125   :  { %11 = sbr.rel (!%p9_p10) target bundleno = 2 (0x2), region = 139 }

</bundles_post_ra>
